<compile_context>
chip_gen: v6e
topology: v6e:2x2x1
jax: 0.10.0
libtpu: 0.0.40
codegen_flags: <defaults>
</compile_context>

<pallas_src>
import jax
import jax.numpy as jnp
import numpy as np
from jax.experimental import pallas as pl
from jax.experimental.pallas import tpu as pltpu


def _round_up(x, m):
    return ((x + m - 1) // m) * m


def _critic_kernel(x_ref, w1_ref, b1_ref, w2_ref, b2_ref, w3_ref, b3_ref, o_ref):
    # Cast the streamed f32 activations to bf16 in-kernel (VPU has slack here).
    x = x_ref[...].astype(jnp.bfloat16)
    # fc1 + ReLU  (bf16 x bf16 -> f32 on the MXU; bias/ReLU in f32 on the VPU)
    h1 = jnp.dot(x, w1_ref[...], preferred_element_type=jnp.float32)
    h1 = jnp.maximum(h1 + b1_ref[...], 0.0)
    # fc2 + ReLU
    h2 = jnp.dot(h1.astype(jnp.bfloat16), w2_ref[...],
                 preferred_element_type=jnp.float32)
    h2 = jnp.maximum(h2 + b2_ref[...], 0.0)
    # fc3 (no activation). w3 is zero-padded to 128 columns so the MXU operand
    # is lane-dense; only column 0 carries the real output, so store just that.
    out = jnp.dot(h2.astype(jnp.bfloat16), w3_ref[...],
                  preferred_element_type=jnp.float32)
    o_ref[...] = (out[:, :1] + b3_ref[...]).astype(o_ref.dtype)


def critic_forward(xs, packed, tile_b=512):
    """xs: (B, F) float32. packed: output of pack_critic_params."""
    w1, b1 = packed["w1"], packed["b1"]
    w2, b2 = packed["w2"], packed["b2"]
    w3, b3 = packed["w3"], packed["b3"]
    F = packed["in_features"]
    assert xs.shape[1] == F
    H1P = w1.shape[1]
    H2P = w2.shape[1]
    OUTP = w3.shape[1]

    B = xs.shape[0]
    # Batch tile: multiple of 8 (sublanes). For small batches this collapses to
    # a single grid step; for large batches it amortizes the ~600-cycle
    # per-step overhead while staying far under VMEM limits on v5e/v6e/v7x.
    TB = min(_round_up(tile_b, 8), _round_up(max(B, 1), 8))
    B_pad = _round_up(B, TB)

    # Only pad the batch dim when needed (zero rows; their outputs are sliced
    # off below -- rows are independent so padding never contaminates real rows).
    x = xs.astype(jnp.float32)
    if B_pad != B:
        x = jnp.pad(x, ((0, B_pad - B), (0, 0)))

    grid = (B_pad // TB,)

    flops = 2 * B_pad * (F * H1P + H1P * H2P + H2P * OUTP)
    bytes_accessed = (B_pad * F * 4                                    # xs (f32)
                      + (F * H1P + H1P * H2P + H2P * OUTP) * 2         # weights (bf16)
                      + (H1P + H2P + 1) * 4                            # biases (f32)
                      + B_pad * 1 * 4)                                 # out (f32, 1 col)

    out = pl.pallas_call(
        _critic_kernel,
        out_shape=jax.ShapeDtypeStruct((B_pad, 1), jnp.float32),
        grid=grid,
        in_specs=[
            pl.BlockSpec((TB, F), lambda i: (i, 0)),      # xs: streamed per batch tile
            pl.BlockSpec((F, H1P), lambda i: (0, 0)),     # weights/biases: resident
            pl.BlockSpec((1, H1P), lambda i: (0, 0)),
            pl.BlockSpec((H1P, H2P), lambda i: (0, 0)),
            pl.BlockSpec((1, H2P), lambda i: (0, 0)),
            pl.BlockSpec((H2P, OUTP), lambda i: (0, 0)),
            pl.BlockSpec((1, 1), lambda i: (0, 0)),
        ],
        out_specs=pl.BlockSpec((TB, 1), lambda i: (i, 0)),
        compiler_params=pltpu.CompilerParams(
            dimension_semantics=("parallel",)),
        cost_estimate=pl.CostEstimate(flops=int(flops), transcendentals=0,
                                      bytes_accessed=int(bytes_accessed)),
    )(x, w1, b1, w2, b2, w3, b3)

    return out[:B]


def fanin_init_bound(size, fanin=None):
    # Mirrors the PyTorch fanin_init: uniform(-v, v) with v = 1/sqrt(size[0]).
    fanin = fanin or size[0]
    return 1.0 / np.sqrt(fanin)


def make_critic_params(key, nb_states, nb_actions, nb_goals,
                       hidden1=400, hidden2=300, init_w=0.003):
    """Float32 'master' params, stored transposed vs nn.Linear: (in, out)."""
    in_dim = nb_states + nb_actions + nb_goals
    k1, k2, k3, kb1, kb2, kb3 = jax.random.split(key, 6)

    # PyTorch fc1.weight has size (hidden1, in_dim) -> fanin_init uses size[0].
    v1 = fanin_init_bound((hidden1, in_dim))
    v2 = fanin_init_bound((hidden2, hidden1))

    w1 = jax.random.uniform(k1, (in_dim, hidden1), jnp.float32, -v1, v1)
    w2 = jax.random.uniform(k2, (hidden1, hidden2), jnp.float32, -v2, v2)
    w3 = jax.random.uniform(k3, (hidden2, 1), jnp.float32, -init_w, init_w)

    # Biases: nn.Linear default uniform(-1/sqrt(in_features), +...); init_weights
    # does not touch them.
    bb1 = 1.0 / np.sqrt(in_dim)
    bb2 = 1.0 / np.sqrt(hidden1)
    bb3 = 1.0 / np.sqrt(hidden2)
    b1 = jax.random.uniform(kb1, (1, hidden1), jnp.float32, -bb1, bb1)
    b2 = jax.random.uniform(kb2, (1, hidden2), jnp.float32, -bb2, bb2)
    b3 = jax.random.uniform(kb3, (1, 1), jnp.float32, -bb3, bb3)

    return {"w1": w1, "b1": b1, "w2": w2, "b2": b2, "w3": w3, "b3": b3}


def pack_critic_params(params, out_pad=128):
    """Zero-pad hidden dims to lane multiples and cast matmul operands to bf16.

    The feature dim is intentionally NOT padded (the xs block spans full rows,
    so the DMA is already one contiguous chunk, and padding it would only
    multiply xs HBM traffic for zero compute benefit).
    """
    w1, b1 = params["w1"], params["b1"]
    w2, b2 = params["w2"], params["b2"]
    w3, b3 = params["w3"], params["b3"]
    F, H1 = w1.shape
    H2 = w2.shape[1]

    H1P = _round_up(H1, 128)        # lane-aligned hidden dims (e.g. 400 -> 512)
    H2P = _round_up(H2, 128)        # (e.g. 300 -> 384)

    w1p = jnp.zeros((F, H1P), jnp.bfloat16).at[:, :H1].set(w1.astype(jnp.bfloat16))
    w2p = jnp.zeros((H1P, H2P), jnp.bfloat16).at[:H1, :H2].set(w2.astype(jnp.bfloat16))
    w3p = jnp.zeros((H2P, out_pad), jnp.bfloat16).at[:H2, :1].set(w3.astype(jnp.bfloat16))

    # Biases padded with ZEROS (required for padding exactness), kept in f32.
    b1p = jnp.zeros((1, H1P), jnp.float32).at[:, :H1].set(b1)
    b2p = jnp.zeros((1, H2P), jnp.float32).at[:, :H2].set(b2)
    b3p = b3.astype(jnp.float32).reshape(1, 1)

    return {"w1": w1p, "b1": b1p, "w2": w2p, "b2": b2p, "w3": w3p, "b3": b3p,
            "in_features": F}


def critic_forward_ref(xs, params):
    h1 = jnp.maximum(xs @ params["w1"] + params["b1"], 0.0)
    h2 = jnp.maximum(h1 @ params["w2"] + params["b2"], 0.0)
    return h2 @ params["w3"] + params["b3"]


if __name__ == "__main__":
    # Small shapes consistent with the module's forward.
    batch = 2
    nb_states, nb_actions, nb_goals = 8, 4, 4     # F = 16
    hidden1, hidden2 = 32, 32

    key = jax.random.PRNGKey(0)
    kp, kx = jax.random.split(key)
    params = make_critic_params(kp, nb_states, nb_actions, nb_goals,
                                hidden1=hidden1, hidden2=hidden2)
    packed = pack_critic_params(params)

    xs = jax.random.normal(kx, (batch, nb_states + nb_actions + nb_goals),
                           jnp.float32)

    out = critic_forward(xs, packed)
    out = jax.block_until_ready(out)

    ref = critic_forward_ref(xs, params)
    assert out.shape == (batch, 1)
    # bf16 matmul operands (f32 accumulation) -> looser tolerance than pure f32.
    np.testing.assert_allclose(np.asarray(out), np.asarray(ref),
                               rtol=1e-2, atol=1e-2)

    # Exercise a multi-step batch grid (grid > 1) with batch padding.
    batch2 = 40
    xs2 = jax.random.normal(jax.random.PRNGKey(7), (batch2, 16), jnp.float32)
    out2 = jax.block_until_ready(critic_forward(xs2, packed, tile_b=16))
    ref2 = critic_forward_ref(xs2, params)
    assert out2.shape == (batch2, 1)
    np.testing.assert_allclose(np.asarray(out2), np.asarray(ref2),
                               rtol=1e-2, atol=1e-2)

    print("KERNEL_OK")
</pallas_src>

<mosaic_0001>
module attributes {stable_mosaic.version = 11 : i64} {
  func.func @_critic_kernel(%arg0: i32, %arg1: memref<8x16xf32, #tpu.memory_space<vmem>>, %arg2: memref<16x128xbf16, #tpu.memory_space<vmem>>, %arg3: memref<1x128xf32, #tpu.memory_space<vmem>>, %arg4: memref<128x128xbf16, #tpu.memory_space<vmem>>, %arg5: memref<1x128xf32, #tpu.memory_space<vmem>>, %arg6: memref<128x128xbf16, #tpu.memory_space<vmem>>, %arg7: memref<1x1xf32, #tpu.memory_space<vmem>>, %arg8: memref<8x1xf32, #tpu.memory_space<vmem>>) attributes {dimension_semantics = [#tpu.dimension_semantics<parallel>], iteration_bounds = array<i64: 1>, scalar_prefetch = 0 : i64, scratch_operands = 0 : i64, tpu.core_type = #tpu.core_type<tc>, window_params = [{transform_indices = @transform_0, window_bounds = array<i64: 8, 16>}, {pipeline_mode = #tpu.pipeline_mode<synchronous>, transform_indices = @transform_1, window_bounds = array<i64: 16, 128>}, {pipeline_mode = #tpu.pipeline_mode<synchronous>, transform_indices = @transform_2, window_bounds = array<i64: 1, 128>}, {pipeline_mode = #tpu.pipeline_mode<synchronous>, transform_indices = @transform_3, window_bounds = array<i64: 128, 128>}, {pipeline_mode = #tpu.pipeline_mode<synchronous>, transform_indices = @transform_4, window_bounds = array<i64: 1, 128>}, {pipeline_mode = #tpu.pipeline_mode<synchronous>, transform_indices = @transform_5, window_bounds = array<i64: 128, 128>}, {pipeline_mode = #tpu.pipeline_mode<synchronous>, transform_indices = @transform_6, window_bounds = array<i64: 1, 1>}, {transform_indices = @transform_7, window_bounds = array<i64: 8, 1>}]} {
    %c0 = arith.constant 0 : index
    %c0_0 = arith.constant 0 : index
    %0 = vector.load %arg1[%c0, %c0_0] : memref<8x16xf32, #tpu.memory_space<vmem>>, vector<8x16xf32>
    %1 = arith.truncf %0 : vector<8x16xf32> to vector<8x16xbf16>
    %c0_1 = arith.constant 0 : index
    %c0_2 = arith.constant 0 : index
    %2 = vector.load %arg2[%c0_1, %c0_2] : memref<16x128xbf16, #tpu.memory_space<vmem>>, vector<16x128xbf16>
    %cst = arith.constant dense<0.000000e+00> : vector<8x128xf32>
    %3 = tpu.matmul %1, %2, %cst {dimension_numbers = #tpu.dot_dimension_numbers<[1], [0], [0], [1], [0, 0, 1, 1], [], []>} : vector<8x16xbf16>, vector<16x128xbf16>, vector<8x128xf32> -> vector<8x128xf32>
    %c0_3 = arith.constant 0 : index
    %c0_4 = arith.constant 0 : index
    %4 = vector.load %arg3[%c0_3, %c0_4] : memref<1x128xf32, #tpu.memory_space<vmem>>, vector<1x128xf32>
    %5 = vector.broadcast %4 : vector<1x128xf32> to vector<8x128xf32>
    %6 = arith.addf %3, %5 : vector<8x128xf32>
    %cst_5 = arith.constant 0.000000e+00 : f32
    %7 = vector.broadcast %cst_5 : f32 to vector<8x128xf32>
    %8 = arith.maximumf %6, %7 : vector<8x128xf32>
    %9 = arith.truncf %8 : vector<8x128xf32> to vector<8x128xbf16>
    %c0_6 = arith.constant 0 : index
    %c0_7 = arith.constant 0 : index
    %10 = vector.load %arg4[%c0_6, %c0_7] : memref<128x128xbf16, #tpu.memory_space<vmem>>, vector<128x128xbf16>
    %cst_8 = arith.constant dense<0.000000e+00> : vector<8x128xf32>
    %11 = tpu.matmul %9, %10, %cst_8 {dimension_numbers = #tpu.dot_dimension_numbers<[1], [0], [0], [1], [0, 0, 1, 1], [], []>} : vector<8x128xbf16>, vector<128x128xbf16>, vector<8x128xf32> -> vector<8x128xf32>
    %c0_9 = arith.constant 0 : index
    %c0_10 = arith.constant 0 : index
    %12 = vector.load %arg5[%c0_9, %c0_10] : memref<1x128xf32, #tpu.memory_space<vmem>>, vector<1x128xf32>
    %13 = vector.broadcast %12 : vector<1x128xf32> to vector<8x128xf32>
    %14 = arith.addf %11, %13 : vector<8x128xf32>
    %cst_11 = arith.constant 0.000000e+00 : f32
    %15 = vector.broadcast %cst_11 : f32 to vector<8x128xf32>
    %16 = arith.maximumf %14, %15 : vector<8x128xf32>
    %17 = arith.truncf %16 : vector<8x128xf32> to vector<8x128xbf16>
    %c0_12 = arith.constant 0 : index
    %c0_13 = arith.constant 0 : index
    %18 = vector.load %arg6[%c0_12, %c0_13] : memref<128x128xbf16, #tpu.memory_space<vmem>>, vector<128x128xbf16>
    %cst_14 = arith.constant dense<0.000000e+00> : vector<8x128xf32>
    %19 = tpu.matmul %17, %18, %cst_14 {dimension_numbers = #tpu.dot_dimension_numbers<[1], [0], [0], [1], [0, 0, 1, 1], [], []>} : vector<8x128xbf16>, vector<128x128xbf16>, vector<8x128xf32> -> vector<8x128xf32>
    %20 = vector.extract_strided_slice %19 {offsets = [0, 0], sizes = [8, 1], strides = [1, 1]} : vector<8x128xf32> to vector<8x1xf32>
    %c0_15 = arith.constant 0 : index
    %c0_16 = arith.constant 0 : index
    %21 = vector.load %arg7[%c0_15, %c0_16] : memref<1x1xf32, #tpu.memory_space<vmem>>, vector<1x1xf32>
    %22 = vector.broadcast %21 : vector<1x1xf32> to vector<8x1xf32>
    %23 = arith.addf %20, %22 : vector<8x1xf32>
    %c0_17 = arith.constant 0 : index
    %c0_18 = arith.constant 0 : index
    %24 = vector.load %arg8[%c0_17, %c0_18] : memref<8x1xf32, #tpu.memory_space<vmem>>, vector<8x1xf32>
    tpu.vector_store %arg8[%c0_17, %c0_18], %23 {strides = array<i32>} : memref<8x1xf32, #tpu.memory_space<vmem>>, vector<8x1xf32>,
    return
  }
  func.func @transform_0(%arg0: i32) -> (i32, i32) {
    %c0_i32 = arith.constant 0 : i32
    %c0_i32_0 = arith.constant 0 : i32
    return %arg0, %c0_i32 : i32, i32
  }
  func.func @transform_1(%arg0: i32) -> (i32, i32) {
    %c0_i32 = arith.constant 0 : i32
    %c0_i32_0 = arith.constant 0 : i32
    %c0_i32_1 = arith.constant 0 : i32
    return %c0_i32, %c0_i32_0 : i32, i32
  }
  func.func @transform_2(%arg0: i32) -> (i32, i32) {
    %c0_i32 = arith.constant 0 : i32
    %c0_i32_0 = arith.constant 0 : i32
    %c0_i32_1 = arith.constant 0 : i32
    return %c0_i32, %c0_i32_0 : i32, i32
  }
  func.func @transform_3(%arg0: i32) -> (i32, i32) {
    %c0_i32 = arith.constant 0 : i32
    %c0_i32_0 = arith.constant 0 : i32
    %c0_i32_1 = arith.constant 0 : i32
    return %c0_i32, %c0_i32_0 : i32, i32
  }
  func.func @transform_4(%arg0: i32) -> (i32, i32) {
    %c0_i32 = arith.constant 0 : i32
    %c0_i32_0 = arith.constant 0 : i32
    %c0_i32_1 = arith.constant 0 : i32
    return %c0_i32, %c0_i32_0 : i32, i32
  }
  func.func @transform_5(%arg0: i32) -> (i32, i32) {
    %c0_i32 = arith.constant 0 : i32
    %c0_i32_0 = arith.constant 0 : i32
    %c0_i32_1 = arith.constant 0 : i32
    return %c0_i32, %c0_i32_0 : i32, i32
  }
  func.func @transform_6(%arg0: i32) -> (i32, i32) {
    %c0_i32 = arith.constant 0 : i32
    %c0_i32_0 = arith.constant 0 : i32
    %c0_i32_1 = arith.constant 0 : i32
    return %c0_i32, %c0_i32_0 : i32, i32
  }
  func.func @transform_7(%arg0: i32) -> (i32, i32) {
    %c0_i32 = arith.constant 0 : i32
    %c0_i32_0 = arith.constant 0 : i32
    return %arg0, %c0_i32 : i32, i32
  }
}

</mosaic_0001>

<bundles_post_ra>
// kernel: tpu_custom_call.1
= control target key start
LH: loop header
LB: loop body
LE: loop exit
PB: predicated region body
PF: predicated region fallthrough
CT: control target
= control target key end

     0   :  { %s678_s0 = inlined_call_operand.hbm [shape: f32[8,16], index: 0, kind: input, shape index: {}]   ;;  %s679_s1 = inlined_call_operand.hbm [shape: bf16[16,128], index: 1, kind: input, shape index: {}]   ;;  %s680_s2 = inlined_call_operand.vmem [shape: f32[1,128], index: 2, kind: input, shape index: {}]   ;;  %s681_s3 = inlined_call_operand.hbm [shape: bf16[128,128], index: 3, kind: input, shape index: {}]   ;;  %s682_s4 = inlined_call_operand.vmem [shape: f32[1,128], index: 4, kind: input, shape index: {}]   ;;  %s683_s5 = inlined_call_operand.hbm [shape: bf16[128,128], index: 5, kind: input, shape index: {}]   ;;  %s684_s6 = inlined_call_operand.<no memory space> [shape: f32[1,1], index: 6, kind: input, shape index: {}]   ;;  %s685_s7 = inlined_call_operand.vmem [shape: f32[8,1], index: 7, kind: output, shape index: {}]  }
   0x1   :  { %v12_v0 = vstv %s684_s6 }
   0x2   :  { %13 = vst [vmem:[#allocation2] sm:$0x1] %v12_v0 }
   0x3   :  { %14 = vsyncpa [#allocation4], 0 }
   0x4   :  { %15 = vsyncpa [#allocation6], 0 }
   0x5   :  { %16 = vsyncpa [#allocation9], 0  ;;  %s577_s26 = smov [#allocation5]  }
   0x6   :  { %s32_s27 = sshll.u32 %s577_s26, 4  ;;  %s33_s27 = int_to_ptr.vmem [resolvable:$true] %s32_s27 }
   0x7   :  { %s499_s28 = scalar_lea.vmem %s33_s27, 128  ;;  %p504_p1 = scmp.lt.s32.totalorder %s33_s27, %s33_s27 }
   0x8   :  { %p500_p0 = scmp.ne.s32.totalorder %s33_s27, %s499_s28  ;;  %p505_p2 = scmp.lt.s32.totalorder %s499_s28, %s499_s28 }
   0xa   :  { %p506_p3 = por %p505_p2, %p504_p1 }
   0xc   :  { %p507_p4 = pnand %p506_p3, %p500_p0 }
   0xe   :  { %510 = shalt.err (!%p507_p4)
}
   0xf   :  { %s578_s29 = smov 64   ;;  %s579_s30 = smov 4  }
  0x10   :  { %38 = dma.hbm_to_vmem [thread:$0]  %s679_s1, 128, %s33_s27, [#allocation6], %s578_s29, %s578_s29, %s579_s30  }
  0x11   :  { %s580_s9 = smov [#allocation3]   ;;  %s581_s11 = smov [#allocation7]  }
  0x12   :  { %s23_s10 = sshll.u32 %s580_s9, 4  ;;  %s46_s12 = sshll.u32 %s581_s11, 4  ;;  %s24_s10 = int_to_ptr.vmem [resolvable:$true] %s23_s10  ;;  %s47_s12 = int_to_ptr.vmem [resolvable:$true] %s46_s12 }
  0x13   :  { %s519_s13 = scalar_lea.vmem %s24_s10, 128  ;;  %p524_p6 = scmp.lt.s32.totalorder %s24_s10, %s24_s10 }
  0x14   :  { %p520_p5 = scmp.ne.s32.totalorder %s24_s10, %s519_s13  ;;  %p525_p7 = scmp.lt.s32.totalorder %s519_s13, %s519_s13 }
  0x16   :  { %p526_p8 = por %p525_p7, %p524_p6 }
  0x18   :  { %p527_p9 = pnand %p526_p8, %p520_p5 }
  0x1a   :  { %530 = shalt.err (!%p527_p9)
}
  0x1b   :  { %26 = dma.hbm_to_vmem [thread:$0]  %s678_s0, 128, %s24_s10, [#allocation4]  }
  0x1c   :  { %s539_s16 = scalar_lea.vmem %s47_s12, 1024  ;;  %p544_p11 = scmp.lt.s32.totalorder %s47_s12, %s47_s12 }
  0x1d   :  { %p540_p10 = scmp.ne.s32.totalorder %s47_s12, %s539_s16  ;;  %p545_p12 = scmp.lt.s32.totalorder %s539_s16, %s539_s16 }
  0x1f   :  { %p546_p13 = por %p545_p12, %p544_p11 }
  0x21   :  { %p547_p0 = pnand %p546_p13, %p540_p10 }
  0x23   :  { %550 = shalt.err (!%p547_p0)
}
  0x24   :  { %52 = dma.hbm_to_vmem [thread:$0]  %s681_s3, 1024, %s47_s12, [#allocation6], %s578_s29, %s578_s29, %s579_s30  }
  0x25   :  { %s582_s18 = smov [#allocation8]  }
  0x26   :  { %s60_s19 = sshll.u32 %s582_s18, 4  ;;  %s61_s19 = int_to_ptr.vmem [resolvable:$true] %s60_s19 }
  0x27   :  { %s559_s20 = scalar_lea.vmem %s61_s19, 1024  ;;  %p564_p2 = scmp.lt.s32.totalorder %s61_s19, %s61_s19 }
  0x28   :  { %p560_p1 = scmp.ne.s32.totalorder %s61_s19, %s559_s20  ;;  %p565_p3 = scmp.lt.s32.totalorder %s559_s20, %s559_s20 }
  0x2a   :  { %p566_p4 = por %p565_p3, %p564_p2 }
  0x2c   :  { %p567_p5 = pnand %p566_p4, %p560_p1 }
  0x2e   :  { %570 = shalt.err (!%p567_p5)
}
  0x2f   :  { %66 = dma.hbm_to_vmem [thread:$0]  %s683_s5, 1024, %s61_s19, [#allocation9], %s578_s29, %s578_s29, %s579_s30  }
  0x30   :  { %571 = dma.done.wait [#allocation4], 128  }
  0x31   :  { %572 = vsyncadd [#allocation4], 4294967168 }
  0x32   :  { %573 = dma.done.wait [#allocation6], 1152  }
  0x33   :  { %574 = vsyncadd [#allocation6], 4294966144 }
  0x34   :  { %575 = dma.done.wait [#allocation9], 1024  }
  0x35   :  { %576 = vsyncadd [#allocation9], 4294966272  ;;  %v583_v1 = vmov 0.0   ;;  %vm584_vm0 = vmmov 0   ;;  %v474_v2 = vld [vmem:[#allocation5] sm:$0xff]   ;;  %v82_v3 = vld [vmem:[#allocation3] sm:$0xff] }
  0x36   :  { %420 = vmatprep.subr.bf16.mxu0 %v583_v1  ;;  %422 = vmatprep.mubr.msk.bf16.mxu0 %vm584_vm0, %v583_v1  ;;  %v83_v4 = vpack.c.bf16 %v82_v3, %v82_v3  ;;  %vm99_vm1 = vcmask 130048   ;;  %v475_v5 = vld [vmem:[#allocation7 + $0x38] sm:$0xff]   ;;  %v476_v6 = vld [vmem:[#allocation7 + $0x30] sm:$0xff]   ;;  %v477_v7 = vld [vmem:[#allocation7 + $0x28] sm:$0xff]   ;;  %vm370_vm2 = vcmask 7168  }
  0x37   :  { %426 = vmatprep.subr.bf16.mxu1 %v583_v1  ;;  %442 = vmatprep.mubr.msk.bf16.mxu1 %vm584_vm0, %v583_v1  ;;  %v478_v8 = vld [vmem:[#allocation7 + $0x20] sm:$0xff]   ;;  %v479_v9 = vld [vmem:[#allocation7 + $0x18] sm:$0xff]   ;;  %v480_v10 = vld [vmem:[#allocation7 + $0x10] sm:$0xff]  }
  0x38   :  { %421 = vmatpush3.bf16.msra.mxu0 %v474_v2  ;;  %427 = vmatpush3.bf16.msra.mxu1 %v475_v5  ;;  %v481_v11 = vld [vmem:[#allocation7 + $0x8] sm:$0xff]   ;;  %v482_v12 = vld [vmem:[#allocation7] sm:$0xff]   ;;  %v483_v13 = vld [vmem:[#allocation8 + $0x38] sm:$0xff]  }
  0x39   :  { %446 = vmatprep.subr.bf16.mxu0 %v583_v1  ;;  %428 = vmatprep.subr.bf16.mxu1 %v583_v1  ;;  %v484_v14 = vld [vmem:[#allocation8 + $0x30] sm:$0xff]   ;;  %v485_v15 = vld [vmem:[#allocation8 + $0x28] sm:$0xff]   ;;  %v486_v16 = vld [vmem:[#allocation8 + $0x20] sm:$0xff]  }
  0x3a   :  { %v487_v17 = vld [vmem:[#allocation8 + $0x18] sm:$0xff]   ;;  %v488_v18 = vld [vmem:[#allocation8 + $0x10] sm:$0xff]   ;;  %v379_v19 = vld [vmem:[%s680_s2] ss:$0 sm:$0xff] }
  0x3b   :  { %423 = vmatmul.mubr.msk.bf16.vlgmr.msra.gmra.mxu0 %vm99_vm1, %v83_v4  ;;  %v489_v27 = vld [vmem:[#allocation8 + $0x8] sm:$0xff]   ;;  %v490_v28 = vld [vmem:[#allocation8] sm:$0xff]  }
  0x3c   :  { %462 = vmatprep.mubr.msk.bf16.mxu0 %vm584_vm0, %v583_v1  ;;  %429 = vmatpush3.bf16.msra.mxu1 %v476_v6  ;;  %v382_v29 = vld [vmem:[%s682_s4] ss:$0 sm:$0xff] }
  0x3d   :  { %430 = vmatprep.subr.bf16.mxu1 %v583_v1  ;;  %447 = vmatpush3.bf16.msra.mxu0 %v483_v13  ;;  %v399_v37 = vld [vmem:[#allocation2] ss:$0 sm:$0xff] }
  0x3e   :  { %448 = vmatprep.subr.bf16.mxu0 %v583_v1 }
  0x40   :  { %431 = vmatpush3.bf16.msra.mxu1 %v477_v7 }
  0x41   :  { %432 = vmatprep.subr.bf16.mxu1 %v583_v1  ;;  %449 = vmatpush3.bf16.msra.mxu0 %v484_v14 }
  0x42   :  { %450 = vmatprep.subr.bf16.mxu0 %v583_v1 }
  0x44   :  { %433 = vmatpush3.bf16.msra.mxu1 %v478_v8 }
  0x45   :  { %434 = vmatprep.subr.bf16.mxu1 %v583_v1  ;;  %451 = vmatpush3.bf16.msra.mxu0 %v485_v15 }
  0x46   :  { %452 = vmatprep.subr.bf16.mxu0 %v583_v1 }
  0x48   :  { %435 = vmatpush3.bf16.msra.mxu1 %v479_v9 }
  0x49   :  { %436 = vmatprep.subr.bf16.mxu1 %v583_v1  ;;  %453 = vmatpush3.bf16.msra.mxu0 %v486_v16 }
  0x4a   :  { %454 = vmatprep.subr.bf16.mxu0 %v583_v1 }
  0x4c   :  { %437 = vmatpush3.bf16.msra.mxu1 %v480_v10 }
  0x4d   :  { %438 = vmatprep.subr.bf16.mxu1 %v583_v1  ;;  %455 = vmatpush3.bf16.msra.mxu0 %v487_v17 }
  0x4e   :  { %456 = vmatprep.subr.bf16.mxu0 %v583_v1 }
  0x50   :  { %439 = vmatpush3.bf16.msra.mxu1 %v481_v11 }
  0x51   :  { %440 = vmatprep.subr.bf16.mxu1 %v583_v1  ;;  %457 = vmatpush3.bf16.msra.mxu0 %v488_v18 }
  0x52   :  { %458 = vmatprep.subr.bf16.mxu0 %v583_v1 }
  0x54   :  { %441 = vmatpush3.bf16.msra.mxu1 %v482_v12 }
  0x55   :  { %459 = vmatpush3.bf16.msra.mxu0 %v489_v27 }
  0x56   :  { %460 = vmatprep.subr.bf16.mxu0 %v583_v1 }
  0x59   :  { %461 = vmatpush3.bf16.msra.mxu0 %v490_v28 }
  0xfb   :  { %v137_v20 = vpop.f32.mrf.mxu0 }
  0xfc   :  { %v138_v21 = vadd.f32 %v379_v19, %v137_v20 }
  0xfd   :  { %v424_v22 = vpop.f32.mrf.mxu0 }
  0xfe   :  { %v143_v23 = vmax.f32 %v138_v21, 0.0 }
  0xff   :  { %v140_v24 = vpop.f32.mrf.mxu0 }
 0x100   :  { %v144_v25 = vpack.c.bf16 %v143_v23, %v143_v23 }
 0x101   :  { %v425_v26 = vpop.f32.mrf.mxu0 }
 0x102   :  { %443 = vmatmul.mubr.bf16.vlgmr.msra.gmra.mxu1 %v144_v25 }
 0x1c2   :  { %v250_v30 = vpop.f32.mrf.mxu1 }
 0x1c3   :  { %v251_v31 = vadd.f32 %v382_v29, %v250_v30 }
 0x1c4   :  { %v444_v32 = vpop.f32.mrf.mxu1 }
 0x1c5   :  { %v256_v33 = vmax.f32 %v251_v31, 0.0 }
 0x1c6   :  { %v253_v34 = vpop.f32.mrf.mxu1 }
 0x1c7   :  { %v257_v35 = vpack.c.bf16 %v256_v33, %v256_v33 }
 0x1c8   :  { %v445_v36 = vpop.f32.mrf.mxu1 }
 0x1c9   :  { %463 = vmatmul.mubr.bf16.vlgmr.msra.gmra.mxu0 %v257_v35 }
 0x289   :  { %v356_v38 = vpop.f32.mrf.mxu0 }
 0x28a   :  { %v369_v39 = vadd.f32 %v399_v37, %v356_v38 }
 0x28b   :  { %v464_v40 = vpop.f32.mrf.mxu0 }
 0x28c   :  { %371 = vst.msk [vmem:[%s685_s7] sm:$0xff] %vm370_vm2, %v369_v39 }
 0x28d   :  { %v359_v41 = vpop.f32.mrf.mxu0 }
 0x28f   :  { %v465_v42 = vpop.f32.mrf.mxu0 }
 0x290   :  { %376 = vsyncpa [#allocation4], 1 }
 0x291   :  { %377 = vsyncpa [#allocation6], 1 }
 0x292   :  { %378 = vsyncpa [#allocation9], 1 }

</bundles_post_ra>
